<compile_context>
chip_gen: v5e
topology: v5e:2x2
jax: 0.10.0
libtpu: 0.0.40
codegen_flags: <defaults>
</compile_context>

<pallas_src>
import functools
import math

import jax
import jax.numpy as jnp
from jax import lax
from jax.experimental import pallas as pl
from jax.experimental.pallas import tpu as pltpu

# Make the pure-JAX reference use true-f32 matmuls too (the kernel requests
# HIGHEST explicitly); default TPU matmul precision is bf16-ish and would
# make the reference, not the kernel, the inaccurate side of the comparison.
jax.config.update("jax_default_matmul_precision", "highest")


# ---------------------------------------------------------------------------
# Kernel
# ---------------------------------------------------------------------------

def _sdpa_kernel(*refs, bb, has_mask, return_attn, inv_sqrt_dk,
                 score_mask_value):
    if has_mask:
        q_ref, k_ref, v_ref, mask_ref = refs[:4]
        rest = refs[4:]
    else:
        q_ref, k_ref, v_ref = refs[:3]
        mask_ref = None
        rest = refs[3:]
    wq_ref, wk_ref, ctx_ref = rest[0], rest[1], rest[2]
    attn_ref = rest[3] if return_attn else None

    prec = lax.Precision.HIGHEST            # true-f32 MXU passes (PyTorch parity)
    wq = wq_ref[...]
    wk = wk_ref[...]
    scale = jnp.float32(inv_sqrt_dk)

    # Static unroll over the bb batch elements of this grid step; every matmul
    # stays 2-D, so no in-kernel reshape / relayout is ever needed.
    for b in range(bb):
        # Projections (LinearNorm, bias=False). 1/sqrt(d_k) is folded into the
        # small projected Q instead of scaling the (Tq, Tk) score matrix.
        qp = jnp.dot(q_ref[b], wq, precision=prec,
                     preferred_element_type=jnp.float32) * scale      # (Tq, d_a)
        kp = jnp.dot(k_ref[b], wk, precision=prec,
                     preferred_element_type=jnp.float32)              # (Tk, d_a)

        # Scores: contract the feature dims directly — kp^T never materialized.
        scores = lax.dot_general(
            qp, kp, dimension_numbers=(((1,), (1,)), ((), ())),
            precision=prec, preferred_element_type=jnp.float32)       # (Tq, Tk)

        if mask_ref is not None:
            # masked_fill_(mask == 0, score_mask_value) semantics.
            scores = jnp.where(mask_ref[b] == 0,
                               jnp.float32(score_mask_value), scores)

        # Numerically stable softmax with an exact normalization divide.
        scores = scores - jnp.max(scores, axis=-1, keepdims=True)
        probs = jnp.exp(scores)
        attn = probs / jnp.sum(probs, axis=-1, keepdims=True)

        # TODO(synk): dropout omitted (module evaluated in eval mode -> identity).

        ctx = jnp.dot(attn, v_ref[b], precision=prec,
                      preferred_element_type=jnp.float32)             # (Tq, d_v)

        ctx_ref[b] = ctx.astype(ctx_ref.dtype)
        if attn_ref is not None:
            attn_ref[b] = attn.astype(attn_ref.dtype)


# ---------------------------------------------------------------------------
# VMEM budgeting (generation-aware, padding- and double-buffer-aware)
# ---------------------------------------------------------------------------

def _round_up(x, m):
    return -(-x // m) * m


def _padded_vmem_bytes(shape, itemsize):
    """Bytes of one VMEM buffer holding `shape`, padded to the HW tiling."""
    sublane = {4: 8, 2: 16, 1: 32}.get(itemsize, 8)
    dims = (1,) * max(0, 2 - len(shape)) + tuple(shape)
    lead = 1
    for d in dims[:-2]:
        lead *= d
    return lead * _round_up(dims[-2], sublane) * _round_up(dims[-1], 128) * itemsize


def _vmem_limits():
    """(scoped_vmem_limit_bytes, per_step_tile_budget_bytes)."""
    phys = 64 * 1024 * 1024                    # conservative (v7x-sized) fallback
    try:
        phys = int(pltpu.get_tpu_info().vmem_capacity_bytes)
    except Exception:
        pass
    # 32 MiB scoped on v7x (64 MiB physical), 64 MiB on v5e/v6e (128 MiB).
    scoped = min(phys // 2, 64 * 1024 * 1024)
    return scoped, (scoped * 3) // 4


def _step_vmem_bytes(bb, Tq, Tk, d_q, d_k, d_v, d_a, mask_itemsize,
                     with_attn_out):
    f32 = 4
    streamed = (_padded_vmem_bytes((bb, Tq, d_q), f32)
                + _padded_vmem_bytes((bb, Tk, d_k), f32)
                + _padded_vmem_bytes((bb, Tk, d_v), f32)
                + _padded_vmem_bytes((bb, Tq, d_v), f32)     # ctx out
                + _padded_vmem_bytes((d_q, d_a), f32)
                + _padded_vmem_bytes((d_k, d_a), f32))
    if with_attn_out:
        streamed += _padded_vmem_bytes((bb, Tq, Tk), f32)    # attn out
    if mask_itemsize is not None:
        streamed += _padded_vmem_bytes((bb, Tq, Tk), mask_itemsize)
    # In-kernel intermediates (qp, kp, scores, probs, ctx) — live one batch
    # element at a time; counted twice as regalloc/copy slack.
    interm = (_padded_vmem_bytes((Tq, d_a), f32)
              + _padded_vmem_bytes((Tk, d_a), f32)
              + 2 * _padded_vmem_bytes((Tq, Tk), f32)
              + _padded_vmem_bytes((Tq, d_v), f32))
    return 2 * streamed + 2 * interm            # x2 streamed: double-buffering


def _pick_batch_block(B, step_bytes_fn, budget, max_unroll=8):
    """Largest divisor bb of B that fits `budget`, keeps >=2 grid steps when
    B > 1 (DMA pipelining + v7x dual TensorCores) and a small static unroll."""
    best = 1
    for bb in range(1, min(B, max_unroll) + 1):
        if B % bb:
            continue
        if B > 1 and B // bb < 2:
            continue
        if step_bytes_fn(bb) > budget:
            continue
        best = bb
    return best


# ---------------------------------------------------------------------------
# Wrapper
# ---------------------------------------------------------------------------

def scaled_dot_product_attention(q, k, v, wq, wk, mask=None,
                                 score_mask_value=1e-9, return_attn=True):
    """q: [B,Tq,d_q], k: [B,Tk,d_k], v: [B,Tk,d_v], wq: [d_q,d_a], wk: [d_k,d_a].

    Returns (context, attention_weights), or just context if return_attn=False.
    """
    B, Tq, d_q = q.shape
    _, Tk, d_k = k.shape
    d_v = v.shape[-1]
    d_a = wq.shape[-1]

    if mask is not None and mask.dtype == jnp.bool_:
        mask = mask.astype(jnp.int8)     # bool VMEM tiles are awkward; 1 B/elem

    scoped_vmem, tile_budget = _vmem_limits()
    step_fn = functools.partial(
        _step_vmem_bytes, Tq=Tq, Tk=Tk, d_q=d_q, d_k=d_k, d_v=d_v, d_a=d_a,
        mask_itemsize=None if mask is None else mask.dtype.itemsize,
        with_attn_out=return_attn)
    bb = _pick_batch_block(B, step_fn, tile_budget)
    grid = (B // bb,)

    in_specs = [
        pl.BlockSpec((bb, Tq, d_q), lambda b: (b, 0, 0)),   # q
        pl.BlockSpec((bb, Tk, d_k), lambda b: (b, 0, 0)),   # k
        pl.BlockSpec((bb, Tk, d_v), lambda b: (b, 0, 0)),   # v
    ]
    inputs = [q, k, v]
    if mask is not None:
        # Stream the caller's mask directly (no extra HBM conversion pass).
        in_specs.append(pl.BlockSpec((bb, Tq, Tk), lambda b: (b, 0, 0)))
        inputs.append(mask)
    in_specs += [pl.BlockSpec((d_q, d_a), lambda b: (0, 0)),  # Wq (replicated)
                 pl.BlockSpec((d_k, d_a), lambda b: (0, 0))]  # Wk (replicated)
    inputs += [wq, wk]

    # Output blocks cover the full (unpadded) last dims. At production shapes,
    # flattening ctx/attn into lane-dense 2-D slabs (last dim a multiple of
    # 128) would avoid masked partial stores; at these tiny shapes it isn't
    # worth the extra in-kernel relayout.
    ctx_shape = jax.ShapeDtypeStruct((B, Tq, d_v), jnp.float32)
    ctx_spec = pl.BlockSpec((bb, Tq, d_v), lambda b: (b, 0, 0))
    if return_attn:
        out_shape = (ctx_shape, jax.ShapeDtypeStruct((B, Tq, Tk), jnp.float32))
        out_specs = [ctx_spec, pl.BlockSpec((bb, Tq, Tk), lambda b: (b, 0, 0))]
    else:
        out_shape = ctx_shape
        out_specs = ctx_spec

    kernel = functools.partial(
        _sdpa_kernel, bb=bb, has_mask=mask is not None, return_attn=return_attn,
        inv_sqrt_dk=1.0 / math.sqrt(d_k), score_mask_value=score_mask_value)

    # TODO(synk): for long Tk, add a Tk grid axis with online softmax so the
    # full (Tq, Tk) score matrix never has to be VMEM-resident (v7x 64 MiB).
    return pl.pallas_call(
        kernel,
        out_shape=out_shape,
        grid_spec=pltpu.PrefetchScalarGridSpec(
            num_scalar_prefetch=0,
            grid=grid,
            in_specs=in_specs,
            out_specs=out_specs),
        compiler_params=pltpu.CompilerParams(
            dimension_semantics=("parallel",),
            vmem_limit_bytes=scoped_vmem),
    )(*inputs)


# ---------------------------------------------------------------------------
# Reference + demo
# ---------------------------------------------------------------------------

def _xavier_uniform(key, in_dim, out_dim, gain):
    # Mirrors torch.nn.init.xavier_uniform_ with calculate_gain('tanh') = 5/3.
    bound = gain * math.sqrt(6.0 / (in_dim + out_dim))
    return jax.random.uniform(key, (in_dim, out_dim), jnp.float32,
                              minval=-bound, maxval=bound)


def _reference(q, k, v, wq, wk, mask=None, score_mask_value=1e-9):
    prec = lax.Precision.HIGHEST
    qp = jnp.matmul(q, wq, precision=prec)
    kp = jnp.matmul(k, wk, precision=prec)
    align = jnp.einsum("bqd,bkd->bqk", qp, kp,
                       precision=prec) / math.sqrt(k.shape[-1])
    if mask is not None:
        align = jnp.where(mask == 0, score_mask_value, align)
    attn = jax.nn.softmax(align, axis=-1)
    ctx = jnp.einsum("bqk,bkd->bqd", attn, v, precision=prec)
    return ctx, attn


if __name__ == "__main__":
    # hparams (small, consistent with the module):
    #   encoder_embedding_dim (d_q) = 32
    #   prosody_embedding_dim (d_k) = 16
    #   ref_attention_dim     (d_a) = 32
    B, Tq, Tk = 2, 8, 8
    d_q, d_k, d_a, d_v = 32, 16, 32, 16

    key = jax.random.PRNGKey(0)
    kq, kk, kv, kwq, kwk, kmask = jax.random.split(key, 6)

    q = jax.random.normal(kq, (B, Tq, d_q), jnp.float32)
    k = jax.random.normal(kk, (B, Tk, d_k), jnp.float32)
    v = jax.random.normal(kv, (B, Tk, d_v), jnp.float32)

    gain_tanh = 5.0 / 3.0
    wq = _xavier_uniform(kwq, d_q, d_a, gain_tanh)
    wk = _xavier_uniform(kwk, d_k, d_a, gain_tanh)

    # No-mask path (no mask HBM stream at all).
    ctx, attn = scaled_dot_product_attention(q, k, v, wq, wk, mask=None)
    jax.block_until_ready((ctx, attn))
    ctx_r, attn_r = _reference(q, k, v, wq, wk, mask=None)
    assert jnp.allclose(ctx, ctx_r, atol=2e-3, rtol=2e-3), \
        float(jnp.max(jnp.abs(ctx - ctx_r)))
    assert jnp.allclose(attn, attn_r, atol=2e-3, rtol=2e-3), \
        float(jnp.max(jnp.abs(attn - attn_r)))

    # Masked path (masked_fill(mask == 0, 1e-9) semantics, as in the module).
    mask = (jax.random.uniform(kmask, (B, Tq, Tk)) > 0.3).astype(jnp.float32)
    ctx_m, attn_m = scaled_dot_product_attention(q, k, v, wq, wk, mask=mask)
    jax.block_until_ready((ctx_m, attn_m))
    ctx_mr, attn_mr = _reference(q, k, v, wq, wk, mask=mask)
    assert jnp.allclose(ctx_m, ctx_mr, atol=2e-3, rtol=2e-3), \
        float(jnp.max(jnp.abs(ctx_m - ctx_mr)))
    assert jnp.allclose(attn_m, attn_mr, atol=2e-3, rtol=2e-3), \
        float(jnp.max(jnp.abs(attn_m - attn_mr)))

    # Context-only fast path (no attention-weights HBM writeback).
    ctx_only = scaled_dot_product_attention(q, k, v, wq, wk, mask=mask,
                                            return_attn=False)
    jax.block_until_ready(ctx_only)
    assert jnp.allclose(ctx_only, ctx_mr, atol=2e-3, rtol=2e-3), \
        float(jnp.max(jnp.abs(ctx_only - ctx_mr)))

    print("KERNEL_OK")
</pallas_src>

<mosaic_0001>
module attributes {stable_mosaic.version = 11 : i64} {
  func.func @_sdpa_kernel(%arg0: i32, %arg1: memref<1x8x32xf32, #tpu.memory_space<vmem>>, %arg2: memref<1x8x16xf32, #tpu.memory_space<vmem>>, %arg3: memref<1x8x16xf32, #tpu.memory_space<vmem>>, %arg4: memref<32x32xf32, #tpu.memory_space<vmem>>, %arg5: memref<16x32xf32, #tpu.memory_space<vmem>>, %arg6: memref<1x8x16xf32, #tpu.memory_space<vmem>>, %arg7: memref<1x8x8xf32, #tpu.memory_space<vmem>>) attributes {dimension_semantics = [#tpu.dimension_semantics<parallel>], iteration_bounds = array<i64: 2>, scalar_prefetch = 0 : i64, scratch_operands = 0 : i64, tpu.core_type = #tpu.core_type<tc>, window_params = [{transform_indices = @transform_0, window_bounds = array<i64: 1, 8, 32>}, {transform_indices = @transform_1, window_bounds = array<i64: 1, 8, 16>}, {transform_indices = @transform_2, window_bounds = array<i64: 1, 8, 16>}, {pipeline_mode = #tpu.pipeline_mode<synchronous>, transform_indices = @transform_3, window_bounds = array<i64: 32, 32>}, {pipeline_mode = #tpu.pipeline_mode<synchronous>, transform_indices = @transform_4, window_bounds = array<i64: 16, 32>}, {transform_indices = @transform_5, window_bounds = array<i64: 1, 8, 16>}, {transform_indices = @transform_6, window_bounds = array<i64: 1, 8, 8>}]} {
    %c0 = arith.constant 0 : index
    %c0_0 = arith.constant 0 : index
    %0 = vector.load %arg4[%c0, %c0_0] : memref<32x32xf32, #tpu.memory_space<vmem>>, vector<32x32xf32>
    %c0_1 = arith.constant 0 : index
    %c0_2 = arith.constant 0 : index
    %1 = vector.load %arg5[%c0_1, %c0_2] : memref<16x32xf32, #tpu.memory_space<vmem>>, vector<16x32xf32>
    %c0_3 = arith.constant 0 : index
    %c0_4 = arith.constant 0 : index
    %c0_5 = arith.constant 0 : index
    %2 = vector.load %arg1[%c0_3, %c0_4, %c0_5] : memref<1x8x32xf32, #tpu.memory_space<vmem>>, vector<1x8x32xf32>
    %3 = vector.shape_cast %2 : vector<1x8x32xf32> to vector<8x32xf32>
    %cst = arith.constant dense<0.000000e+00> : vector<8x32xf32>
    %4 = tpu.matmul %3, %0, %cst {dimension_numbers = #tpu.dot_dimension_numbers<[1], [0], [0], [1], [0, 0, 1, 1], [], []>, precision = #tpu.contract_precision<fp32>} : vector<8x32xf32>, vector<32x32xf32>, vector<8x32xf32> -> vector<8x32xf32>
    %cst_6 = arith.constant 2.500000e-01 : f32
    %5 = vector.broadcast %cst_6 : f32 to vector<8x32xf32>
    %6 = arith.mulf %4, %5 : vector<8x32xf32>
    %c0_7 = arith.constant 0 : index
    %c0_8 = arith.constant 0 : index
    %c0_9 = arith.constant 0 : index
    %7 = vector.load %arg2[%c0_7, %c0_8, %c0_9] : memref<1x8x16xf32, #tpu.memory_space<vmem>>, vector<1x8x16xf32>
    %8 = vector.shape_cast %7 : vector<1x8x16xf32> to vector<8x16xf32>
    %cst_10 = arith.constant dense<0.000000e+00> : vector<8x32xf32>
    %9 = tpu.matmul %8, %1, %cst_10 {dimension_numbers = #tpu.dot_dimension_numbers<[1], [0], [0], [1], [0, 0, 1, 1], [], []>, precision = #tpu.contract_precision<fp32>} : vector<8x16xf32>, vector<16x32xf32>, vector<8x32xf32> -> vector<8x32xf32>
    %cst_11 = arith.constant dense<0.000000e+00> : vector<8x8xf32>
    %10 = tpu.matmul %6, %9, %cst_11 {dimension_numbers = #tpu.dot_dimension_numbers<[1], [1], [0], [0], [0, 0, 1, 0], [], []>, precision = #tpu.contract_precision<fp32>} : vector<8x32xf32>, vector<8x32xf32>, vector<8x8xf32> -> vector<8x8xf32>
    %cst_12 = arith.constant dense<0xFF800000> : vector<8xf32>
    %11 = vector.multi_reduction <maximumf>, %10, %cst_12 [1] : vector<8x8xf32> to vector<8xf32>
    %12 = vector.shape_cast %11 : vector<8xf32> to vector<8x1xf32>
    %13 = vector.broadcast %12 : vector<8x1xf32> to vector<8x8xf32>
    %14 = arith.subf %10, %13 : vector<8x8xf32>
    %15 = math.exp %14 : vector<8x8xf32>
    %cst_13 = arith.constant dense<0.000000e+00> : vector<8xf32>
    %16 = vector.multi_reduction <add>, %15, %cst_13 [1] : vector<8x8xf32> to vector<8xf32>
    %17 = vector.shape_cast %16 : vector<8xf32> to vector<8x1xf32>
    %18 = vector.broadcast %17 : vector<8x1xf32> to vector<8x8xf32>
    %19 = arith.divf %15, %18 : vector<8x8xf32>
    %c0_14 = arith.constant 0 : index
    %c0_15 = arith.constant 0 : index
    %c0_16 = arith.constant 0 : index
    %20 = vector.load %arg3[%c0_14, %c0_15, %c0_16] : memref<1x8x16xf32, #tpu.memory_space<vmem>>, vector<1x8x16xf32>
    %21 = vector.shape_cast %20 : vector<1x8x16xf32> to vector<8x16xf32>
    %cst_17 = arith.constant dense<0.000000e+00> : vector<8x16xf32>
    %22 = tpu.matmul %19, %21, %cst_17 {dimension_numbers = #tpu.dot_dimension_numbers<[1], [0], [0], [1], [0, 0, 1, 1], [], []>, precision = #tpu.contract_precision<fp32>} : vector<8x8xf32>, vector<8x16xf32>, vector<8x16xf32> -> vector<8x16xf32>
    %c0_18 = arith.constant 0 : index
    %c0_19 = arith.constant 0 : index
    %c0_20 = arith.constant 0 : index
    %23 = vector.load %arg6[%c0_18, %c0_19, %c0_20] : memref<1x8x16xf32, #tpu.memory_space<vmem>>, vector<1x8x16xf32>
    %24 = vector.shape_cast %23 : vector<1x8x16xf32> to vector<8x16xf32>
    %25 = vector.shape_cast %22 : vector<8x16xf32> to vector<1x8x16xf32>
    tpu.vector_store %arg6[%c0_18, %c0_19, %c0_20], %25 {strides = array<i32>} : memref<1x8x16xf32, #tpu.memory_space<vmem>>, vector<1x8x16xf32>,
    %c0_21 = arith.constant 0 : index
    %c0_22 = arith.constant 0 : index
    %c0_23 = arith.constant 0 : index
    %26 = vector.load %arg7[%c0_21, %c0_22, %c0_23] : memref<1x8x8xf32, #tpu.memory_space<vmem>>, vector<1x8x8xf32>
    %27 = vector.shape_cast %26 : vector<1x8x8xf32> to vector<8x8xf32>
    %28 = vector.shape_cast %19 : vector<8x8xf32> to vector<1x8x8xf32>
    tpu.vector_store %arg7[%c0_21, %c0_22, %c0_23], %28 {strides = array<i32>} : memref<1x8x8xf32, #tpu.memory_space<vmem>>, vector<1x8x8xf32>,
    return
  }
  func.func @transform_0(%arg0: i32) -> (i32, i32, i32) {
    %c0_i32 = arith.constant 0 : i32
    %c0_i32_0 = arith.constant 0 : i32
    %c0_i32_1 = arith.constant 0 : i32
    return %arg0, %c0_i32, %c0_i32_0 : i32, i32, i32
  }
  func.func @transform_1(%arg0: i32) -> (i32, i32, i32) {
    %c0_i32 = arith.constant 0 : i32
    %c0_i32_0 = arith.constant 0 : i32
    %c0_i32_1 = arith.constant 0 : i32
    return %arg0, %c0_i32, %c0_i32_0 : i32, i32, i32
  }
  func.func @transform_2(%arg0: i32) -> (i32, i32, i32) {
    %c0_i32 = arith.constant 0 : i32
    %c0_i32_0 = arith.constant 0 : i32
    %c0_i32_1 = arith.constant 0 : i32
    return %arg0, %c0_i32, %c0_i32_0 : i32, i32, i32
  }
  func.func @transform_3(%arg0: i32) -> (i32, i32) {
    %c0_i32 = arith.constant 0 : i32
    %c0_i32_0 = arith.constant 0 : i32
    %c0_i32_1 = arith.constant 0 : i32
    return %c0_i32, %c0_i32_0 : i32, i32
  }
  func.func @transform_4(%arg0: i32) -> (i32, i32) {
    %c0_i32 = arith.constant 0 : i32
    %c0_i32_0 = arith.constant 0 : i32
    %c0_i32_1 = arith.constant 0 : i32
    return %c0_i32, %c0_i32_0 : i32, i32
  }
  func.func @transform_5(%arg0: i32) -> (i32, i32, i32) {
    %c0_i32 = arith.constant 0 : i32
    %c0_i32_0 = arith.constant 0 : i32
    %c0_i32_1 = arith.constant 0 : i32
    return %arg0, %c0_i32, %c0_i32_0 : i32, i32, i32
  }
  func.func @transform_6(%arg0: i32) -> (i32, i32, i32) {
    %c0_i32 = arith.constant 0 : i32
    %c0_i32_0 = arith.constant 0 : i32
    %c0_i32_1 = arith.constant 0 : i32
    return %arg0, %c0_i32, %c0_i32_0 : i32, i32, i32
  }
}

</mosaic_0001>

<bundles_post_ra>
// kernel: tpu_custom_call.1
= control target key start
LH: loop header
LB: loop body
LE: loop exit
PB: predicated region body
PF: predicated region fallthrough
CT: control target
= control target key end

     0   :  { %s1975_s0 = inlined_call_operand.hbm [shape: f32[2,8,32], index: 0, kind: input, shape index: {}]   ;;  %s1976_s1 = inlined_call_operand.hbm [shape: f32[2,8,16], index: 1, kind: input, shape index: {}]   ;;  %s1977_s2 = inlined_call_operand.hbm [shape: f32[2,8,16], index: 2, kind: input, shape index: {}]   ;;  %s1978_s3 = inlined_call_operand.hbm [shape: f32[32,32], index: 3, kind: input, shape index: {}]   ;;  %s1979_s4 = inlined_call_operand.hbm [shape: f32[16,32], index: 4, kind: input, shape index: {}]   ;;  %s1980_s5 = inlined_call_operand.hbm [shape: f32[2,8,16], index: 5, kind: output, shape index: {0}]   ;;  %s1981_s6 = inlined_call_operand.hbm [shape: f32[2,8,8], index: 6, kind: output, shape index: {1}]  }
   0x1   :  { %1990 = sst [smem:[#allocation23_spill]] %s1976_s1 }
   0x2   :  { %1991 = sst [smem:[#allocation24_spill]] %s1978_s3 }
   0x3   :  { %12 = vsyncpa [#allocation3], 0 }
   0x4   :  { %14 = vsyncpa [#allocation3 + $0x1], 0 }
   0x5   :  { %15 = vsyncpa [#allocation6], 0 }
   0x6   :  { %17 = vsyncpa [#allocation6 + $0x1], 0 }
   0x7   :  { %18 = vsyncpa [#allocation9], 0 }
   0x8   :  { %19 = vsyncpa [#allocation4], 0 }
   0x9   :  { %21 = vsyncpa [#allocation4 + $0x1], 0 }
   0xa   :  { %22 = vsyncpa [#allocation13], 0 }
   0xb   :  { %24 = vsyncpa [#allocation13 + $0x1], 0  ;;  %s1688_s21 = smov 0   ;;  %s1690_s22 = smov 0  }
   0xc   :  { %s1692_s23 = smov 0   ;;  %s1694_s24 = smov 0  }
   0xd LB: > { %1992 = sst [smem:[#allocation19_spill]] %s1647_s24  ;;  %s1712_s28 = sadd.s32 4294967295, %s1647_s24   ;;  %s1647_s24 = sphi %s1694_s24, %s2012_s24   ;;  %s1643_s23 = sphi %s1692_s23, %s2016_s23   ;;  %s1639_s22 = sphi %s1690_s22, %s2015_s22   ;;  %s1635_s21 = sphi %s1688_s21, %s2014_s21  }
   0xe   : > { %s1993_s3 = sld [smem:[#allocation24_spill]]  ;;  %p1279_p0 = scmp.ge.s32.totalorder %s1647_s24, 1 }
   0xf   : > { %p1989_p1 = scmp.eq.s32.totalorder %s1712_s28, 0  ;;  %p207_p2 = scmp.lt.s32.totalorder %s1647_s24, 3 }
  0x10   : > { %s1649_s30 = smov [#allocation8]   ;;  %s1982_s9 = smov 128  }
  0x11   : > { %p1717_p3 = pnand %p1279_p0, %p207_p2  ;;  %s220_s7 = sshll.u32 %s1649_s30, 4  ;;  %s221_s7 = int_to_ptr.vmem [resolvable:$true] %s220_s7 }
  0x12   : > { %s1984_s10 = smov 8   ;;  %s1278_s11 = sadd.s32 4294967294, %s1647_s24  }
  0x13   : > { %p1321_p4 = pneg %p1717_p3  ;;  %s1737_s12 = sadd.s32 1, %s1647_s24  }
  0x14   : > { %s218_s27 = sshll.u32 %s1993_s3, 4  ;;  %1996 = sst [smem:[#allocation20_spill]] %s1737_s12  ;;  %s219_s27 = int_to_ptr.hbm [resolvable:$true] %s218_s27 }
  0x15   : > { %p1726_p6 = pnand %p1321_p4, %p1989_p1  ;;  %s37_s13 = sadd.s32 1, %s1643_s23 }
  0x16   : > { %s34_s14 = ssub.s32 %s1647_s24, %s1737_s12  ;;  %p44_p7 = scmp.ne.s32.totalorder %s1643_s23, %s1639_s22 }
  0x17   : > { %1324 = dma.hbm_to_vmem [thread:$0]  (!%p1726_p6), %s219_s27, 512, %s221_s7, [#allocation9], %s1982_s9, %s1982_s9, %s1984_s10  }
  0x18   : > { %p35_p8 = scmp.eq.s32.totalorder %s34_s14, 0  ;;  %p45_p9 = scmp.eq.s32.totalorder %s1647_s24, 0 }
  0x19   : > { %p50_p10 = scmp.ne.s32.totalorder %s1639_s22, %s1635_s21  ;;  %p168_p11 = scmp.eq.s32.totalorder %s1712_s28, 1 }
  0x1a   : > { %s1749_s15 = scalar_select %p35_p8, %s1643_s23, %s37_s13  }
  0x1b   : > { %p46_p12 = por %p45_p9, %p44_p7  ;;  %p1753_p13 = por %p1989_p1, %p50_p10 }
  0x1c   : > { %1997 = sst [smem:[#allocation21_spill]] %s1749_s15  ;;  %p1757_p0 = por %p168_p11, %p44_p7 }
  0x1d   : > { %p174_p2 = scmp.eq.s32.totalorder %s1278_s11, 1  ;;  %p1347_p4 = scmp.lt.s32.totalorder %s1647_s24, 2 }
  0x1e   : > { %s1983_s18 = sand.u32 1, %s1643_s23   ;;  %s1772_s25 = sshll.u32 %s1647_s24, 3 }
  0x1f   : > { %p1763_p5 = por %p174_p2, %p50_p10  ;;  %s1769_s20 = sshll.u32 %s1983_s18, 3 }
  0x20   : > { %p1774_p8 = pnand %p1347_p4, %p46_p12  ;;  %s267_s27 = sand.u32 1, %s1647_s24  }
  0x21   : > { %s2000_s19 = scalar_select %p1763_p5, 1, 0 }
  0x22   : > { %s2003_s1 = sld [smem:[#allocation23_spill]]  ;;  %s271_s13 = scalar_lea.vmem [#allocation5], %s1769_s20 }
  0x23   : > { %2001 = sst [smem:[#allocation22_spill]] %s2000_s19  ;;  %s279_s14 = sshll.u32 %s271_s13, 4  ;;  %s280_s14 = int_to_ptr.vmem [resolvable:$true] %s279_s14 }
  0x24   : > { %s232_s3 = sshll.u32 %s1979_s4, 4  ;;  %s1787_s15 = scalar_lea.sflag [#allocation6], %s267_s27  ;;  %s233_s3 = int_to_ptr.hbm [resolvable:$true] %s232_s3 }
  0x25   : > { %p1425_p9 = pneg %p1774_p8 }
  0x28   : > { %s275_s11 = scalar_lea.hbm %s2003_s1, %s1772_s25 }
  0x29   : > { %s277_s9 = sshll.u32 %s275_s11, 4  ;;  %s1428_s11 = scalar_lea.hbm %s2003_s1, 16  ;;  %s278_s9 = int_to_ptr.hbm [resolvable:$true] %s277_s9 }
  0x2a   : > { %s1421_s12 = sshra.s32 %s278_s9, 4  ;;  %s1422_s12 = int_to_ptr.hbm [resolvable:$true] %s1421_s12 }
  0x2b   : > { %s1423_s19 = scalar_lea.hbm %s1422_s12, 8  ;;  %p1429_p12 = scmp.lt.s32.totalorder %s1422_s12, %s2003_s1 }
  0x2c   : > { %p1424_p7 = scmp.ne.s32.totalorder %s1422_s12, %s1423_s19  ;;  %p1430_p2 = scmp.lt.s32.totalorder %s1428_s11, %s1423_s19 }
  0x2e   : > { %p1426_p10 = pnand %p1425_p9, %p1424_p7  ;;  %p1431_p4 = por %p1430_p2, %p1429_p12 }
  0x30   : > { %p1427_p11 = pneg %p1426_p10 }
  0x32   : > { %p1432_p1 = pnand %p1431_p4, %p1427_p11 }
  0x34   : > { %1435 = shalt.err (!%p1432_p1)
}
  0x35   : > { %1334 = dma.hbm_to_vmem [thread:$0]  (!%p1774_p8), %s278_s9, 128, %s280_s14, %s1787_s15  }
  0x36   : > { %s1652_s10 = smov [#allocation10]   ;;  %s2004_s24 = smov 8  }
  0x37   : > { %s234_s18 = sshll.u32 %s1652_s10, 4  ;;  %s2005_s12 = smov 128   ;;  %s235_s18 = int_to_ptr.vmem [resolvable:$true] %s234_s18 }
  0x38   : > { %1327 = dma.hbm_to_vmem [thread:$0]  (!%p1726_p6), %s233_s3, 256, %s235_s18, [#allocation9], %s2005_s12, %s2005_s12, %s2004_s24  }
  0x39   : > { %s256_s30 = scalar_lea.hbm %s1975_s0, %s1772_s25  ;;  %s252_s7 = scalar_lea.vmem [#allocation2], %s1769_s20 }
  0x3a   : > { %s260_s11 = sshll.u32 %s252_s7, 4  ;;  %s258_s13 = sshll.u32 %s256_s30, 4  ;;  %s261_s11 = int_to_ptr.vmem [resolvable:$true] %s260_s11  ;;  %s259_s13 = int_to_ptr.hbm [resolvable:$true] %s258_s13 }
  0x3b   : > { %s2006_s9 = sand.u32 1, %s1643_s23   ;;  %s1481_s1 = sshra.s32 %s259_s13, 4  ;;  %s1482_s1 = int_to_ptr.hbm [resolvable:$true] %s1481_s1 }
  0x3c   : > { %s249_s14 = scalar_lea.sflag [#allocation3], %s2006_s9  ;;  %s1483_s10 = scalar_lea.hbm %s1482_s1, 8 }
  0x3d   : > { %p1484_p1 = scmp.ne.s32.totalorder %s1482_s1, %s1483_s10  ;;  %s1488_s18 = scalar_lea.hbm %s1975_s0, 16 }
  0x3e   : > { %p1489_p6 = scmp.lt.s32.totalorder %s1482_s1, %s1975_s0  ;;  %p1490_p11 = scmp.lt.s32.totalorder %s1488_s18, %s1483_s10 }
  0x3f   : > { %p1486_p7 = pnand %p1484_p1, %p1425_p9 }
  0x40   : > { %p1491_p12 = por %p1490_p11, %p1489_p6 }
  0x41   : > { %p1487_p10 = pneg %p1486_p7 }
  0x43   : > { %p1492_p2 = pnand %p1491_p12, %p1487_p10 }
  0x45   : > { %1495 = shalt.err (!%p1492_p2)
}
  0x46   : > { %1331 = dma.hbm_to_vmem [thread:$0]  (!%p1774_p8), %s259_s13, 128, %s261_s11, %s249_s14  }
  0x47   : > { %s294_s30 = scalar_lea.hbm %s1977_s2, %s1772_s25  ;;  %s290_s7 = scalar_lea.vmem [#allocation7], %s1769_s20 }
  0x48   : > { %s298_s9 = sshll.u32 %s290_s7, 4  ;;  %s296_s3 = sshll.u32 %s294_s30, 4  ;;  %s299_s9 = int_to_ptr.vmem [resolvable:$true] %s298_s9  ;;  %s297_s3 = int_to_ptr.hbm [resolvable:$true] %s296_s3 }
  0x49   : > { %s1511_s1 = sshra.s32 %s297_s3, 4  ;;  %s1518_s11 = scalar_lea.hbm %s1977_s2, 16  ;;  %s1512_s1 = int_to_ptr.hbm [resolvable:$true] %s1511_s1 }
  0x4a   : > { %s1513_s10 = scalar_lea.hbm %s1512_s1, 8  ;;  %p1519_p10 = scmp.lt.s32.totalorder %s1512_s1, %s1977_s2 }
  0x4b   : > { %p1514_p4 = scmp.ne.s32.totalorder %s1512_s1, %s1513_s10  ;;  %p1520_p6 = scmp.lt.s32.totalorder %s1518_s11, %s1513_s10 }
  0x4d   : > { %p1516_p1 = pnand %p1514_p4, %p1425_p9  ;;  %p1521_p11 = por %p1520_p6, %p1519_p10 }
  0x4f   : > { %p1517_p7 = pneg %p1516_p1 }
  0x51   : > { %p1522_p12 = pnand %p1521_p11, %p1517_p7 }
  0x53   : > { %1525 = shalt.err (!%p1522_p12)
}
  0x54   : > { %1337 = dma.hbm_to_vmem [thread:$0]  (!%p1774_p8), %s297_s3, 128, %s299_s9, %s1787_s15  }
  0x55   : > { %307 = sbr.rel (%p1717_p3) target bundleno = 836 (0x344), region = 40  ;;  %s1846_s20 = sand.u32 (!%p1717_p3), 1, %s1639_s22  }
  0x56   : > { %s1849_s25 = sshll.u32 (!%p1717_p3), %s1846_s20, 3  ;;  %s310_s24 = scalar_lea.sflag (!%p1717_p3), [#allocation3], %s1846_s20 }
  0x57   : > { %s313_s12 = scalar_lea.vmem (!%p1717_p3), [#allocation2], %s1849_s25 }
  0x5a   : > { %1614 = dma.done.wait (%p1753_p13), %s310_s24, 128  }
  0x5b   : > { %1616 = vsyncadd (%p1753_p13), %s310_s24, 4294967168  ;;  %s319_s29 = sand.u32 1, %s1712_s28   ;;  %s323_s26 = scalar_lea.vmem [#allocation5], %s1849_s25 }
  0x5c   : > { %s320_s15 = scalar_lea.sflag [#allocation6], %s319_s29 }
  0x5d   : > { %1618 = dma.done.wait (%p1753_p13), %s320_s15, 256  }
  0x5e   : > { %1620 = vsyncadd (%p1753_p13), %s320_s15, 4294967040  ;;  %s333_s19 = scalar_lea.vmem [#allocation7], %s1849_s25  ;;  %p2007_p3 = scmp.eq.s32.totalorder %s1712_s28, 0 }
  0x60   : > { %1622 = dma.done.wait (%p2007_p3), [#allocation9], 768   ;;  %p2008_p8 = pmov %p2007_p3 }
  0x61   : > { %vm395_vm0 = vcmask 261120   ;;  %v391_v0 = vld [vmem:[#allocation8 + $0x18] sm:$0xff]  ;;  %v390_v1 = vld [vmem:[#allocation8 + $0x10] sm:$0xff]  ;;  %v389_v2 = vld [vmem:[#allocation8 + $0x8] sm:$0xff]  ;;  %vm586_vm1 = vcmask 130048   ;;  %vm901_vm2 = vcmask 64512  }
  0x62   : > { %1624 = vsyncadd (%p2008_p8), [#allocation9], 4294966528  ;;  %v1868_v3 = vand.u32 4294901760, %v391_v0  ;;  %v1870_v4 = vand.u32 4294901760, %v390_v1  ;;  %v1872_v5 = vand.u32 4294901760, %v389_v2  ;;  %v388_v6 = vld [vmem:[#allocation8] sm:$0xff] }
  0x63   : > { %v394_v7 = vld [vmem:[%s313_s12] sm:$0xff]  ;;  %v393_v8 = vld [vmem:[#allocation10 + $0x8] sm:$0xff]  ;;  %v1874_v9 = vand.u32 4294901760, %v388_v6  ;;  %v392_v12 = vld [vmem:[#allocation10] sm:$0xff]  ;;  %s387_s16 = scalar_lea.vmem [#allocation12], %s1849_s25  ;;  %s1299_s27 = sshll.u32 %s1712_s28, 3 }
  0x64   : > { %v397_v10 = vsel %vm395_vm0, %v394_v7, 0  ;;  %v1877_v11 = vand.u32 4294901760, %v393_v8  ;;  %v585_v13 = vld [vmem:[%s323_s26] sm:$0xff]  ;;  %412 = vmatpush.msra.mxu0 %v1868_v3  ;;  %v441_v14 = vsub.f32 %v391_v0, %v1868_v3  ;;  %512 = vmatpush.msra.mxu3 %v1868_v3  ;;  %v447_v15 = vsub.f32 %v390_v1, %v1870_v4  ;;  %s1108_s9 = scalar_lea.hbm %s1981_s6, %s1299_s27  ;;  %s1110_s3 = sshll.u32 %s387_s16, 4  ;;  %s1111_s3 = int_to_ptr.vmem [resolvable:$true] %s1110_s3 }
  0x65   : > { %v453_v16 = vsub.f32 %v389_v2, %v1872_v5  ;;  %v1884_v17 = vand.u32 4294901760, %v397_v10  ;;  %v459_v18 = vsub.f32 %v388_v6, %v1874_v9  ;;  %v1890_v20 = vand.u32 4294901760, %v392_v12  ;;  %s1112_s1 = sshll.u32 %s1108_s9, 4  ;;  %s1084_s10 = scalar_lea.sflag [#allocation13], %s1846_s20  ;;  %s1113_s1 = int_to_ptr.hbm [resolvable:$true] %s1112_s1 }
  0x66   : > { %v1888_v19 = vsub.f32 %v393_v8, %v1877_v11  ;;  %v588_v21 = vsel %vm586_vm1, %v585_v13, 0  ;;  %483 = vmatpush.msra.mxu2 %v441_v14  ;;  %414 = vmatpush.msra.mxu0 %v1870_v4  ;;  %v442_v22 = vand.u32 4294901760, %v441_v14  ;;  %v448_v23 = vand.u32 4294901760, %v447_v15  ;;  %s1555_s8 = sshra.s32 %s1113_s1, 4  ;;  %s1561_s28 = scalar_lea.hbm %s1981_s6, 16  ;;  %s1556_s8 = int_to_ptr.hbm [resolvable:$true] %s1555_s8 }
  0x67   : > { %v420_v24 = vsub.f32 %v397_v10, %v1884_v17  ;;  %v454_v25 = vand.u32 4294901760, %v453_v16  ;;  %514 = vmatpush.msra.mxu3 %v1870_v4  ;;  %v460_v26 = vand.u32 4294901760, %v459_v18  ;;  %v638_v28 = vsub.f32 %v392_v12, %v1890_v20  ;;  %s1557_s18 = scalar_lea.hbm %s1556_s8, 8  ;;  %p1562_p4 = scmp.lt.s32.totalorder %s1556_s8, %s1981_s6 }
  0x68   : > { %v633_v27 = vand.u32 4294901760, %v1888_v19  ;;  %v608_v29 = vand.u32 4294901760, %v588_v21  ;;  %486 = vmatpush.msra.mxu2 %v447_v15  ;;  %416 = vmatpush.msra.mxu0 %v1872_v5  ;;  %v443_v30 = vsub.f32 %v441_v14, %v442_v22  ;;  %v449_v31 = vsub.f32 %v447_v15, %v448_v23  ;;  %p1558_p13 = scmp.ne.s32.totalorder %s1556_s8, %s1557_s18  ;;  %p1563_p1 = scmp.lt.s32.totalorder %s1561_s28, %s1557_s18 }
  0x69   : > { %v421_v32 = vand.u32 4294901760, %v420_v24  ;;  %v455_v33 = vsub.f32 %v453_v16, %v454_v25  ;;  %516 = vmatpush.msra.mxu3 %v1872_v5  ;;  %v639_v35 = vand.u32 4294901760, %v638_v28  ;;  %v461_v40 = vsub.f32 %v459_v18, %v460_v26 }
  0x6a   : > { %v634_v34 = vsub.f32 %v1888_v19, %v633_v27  ;;  %v609_v36 = vsub.f32 %v588_v21, %v608_v29  ;;  %v444_v37 = vand.u32 4294901760, %v443_v30  ;;  %489 = vmatpush.msra.mxu2 %v453_v16  ;;  %418 = vmatpush.msra.mxu0 %v1874_v9  ;;  %v450_v38 = vand.u32 4294901760, %v449_v31  ;;  %p1559_p9 = pnand %p1558_p13, %p1757_p0  ;;  %p1564_p7 = por %p1563_p1, %p1562_p4 }
  0x6b   : > { %v422_v39 = vsub.f32 %v420_v24, %v421_v32  ;;  %518 = vmatpush.msra.mxu3 %v1874_v9  ;;  %v640_v41 = vsub.f32 %v638_v28, %v639_v35  ;;  %v456_v44 = vand.u32 4294901760, %v455_v33  ;;  %v462_v47 = vand.u32 4294901760, %v461_v40 }
  0x6c   : > { %541 = vmatpush.msrb.mxu0 %v442_v22  ;;  %v610_v42 = vand.u32 4294901760, %v609_v36  ;;  %445 = vmatpush.msra.mxu1 %v444_v37  ;;  %v635_v45 = vand.u32 4294901760, %v634_v34  ;;  %p1560_p2 = pneg %p1559_p9 }
  0x6d   : > { %492 = vmatpush.msra.mxu2 %v459_v18  ;;  %v423_v43 = vand.u32 4294901760, %v422_v39  ;;  %522 = vmatmul.f32.vlgmr.msra.gmra.mxu3 %v421_v32  ;;  %v641_v48 = vand.u32 4294901760, %v640_v41 }
  0x6e   : > { %495 = vmatmul.f32.vlgmr.msra.gmra.mxu2 %v420_v24  ;;  %v611_v46 = vsub.f32 %v609_v36, %v610_v42  ;;  %451 = vmatpush.msra.mxu1 %v450_v38  ;;  %v926_v38 = vld [vmem:[%s333_s19] sm:$0xff]  ;;  %p1565_p10 = pnand %p1564_p7, %p1560_p2 }
  0x6f   : > { %424 = vmatmul.f32.vlgmr.msra.gmra.mxu0 %v423_v43  ;;  %605 = vmatpush.msrb.mxu2 %v1877_v11  ;;  %v945_v39 = vand.u32 4294901760, %v926_v38 }
  0x70   : > { %545 = vmatpush.msrb.mxu0 %v448_v23  ;;  %457 = vmatpush.msra.mxu1 %v456_v44  ;;  %v612_v49 = vand.u32 4294901760, %v611_v46 }
  0x71   : > { %636 = vmatpush.msrb.mxu3 %v635_v45  ;;  %607 = vmatpush.msrb.mxu2 %v1890_v20  ;;  %v972_v40 = vsub.f32 %v926_v38, %v945_v39 }
  0x72   : > { %549 = vmatpush.msrb.mxu0 %v454_v25  ;;  %463 = vmatpush.msra.mxu1 %v462_v47 }
  0x73   : > { %642 = vmatpush.msrb.mxu3 %v641_v48  ;;  %465 = vmatmul.f32.vlgmr.msra.gmra.mxu1 %v1884_v17  ;;  %v973_v41 = vand.u32 4294901760, %v972_v40 }
  0x74   : > { %553 = vmatpush.msrb.mxu0 %v460_v26  ;;  %572 = vmatpush.msrb.mxu1 %v1868_v3 }
  0x75   : > { %644 = vmatmul.f32.vlgmr.msrb.gmra.mxu3 %v608_v29  ;;  %716 = vmatpush.msra.mxu2 %v633_v27 }
  0x76   : > { %664 = vmatpush.msra.mxu0 %v1888_v19  ;;  %613 = vmatmul.f32.vlgmr.msrb.gmra.mxu2 %v612_v49 }
  0x77   : > { %574 = vmatpush.msrb.mxu1 %v1870_v4  ;;  %555 = vmatmul.f32.vlgmr.msrb.gmra.mxu0 %v1884_v17 }
  0x78   : > { %667 = vmatpush.msra.mxu0 %v638_v28  ;;  %741 = vmatpush.msra.mxu3 %v1877_v11 }
  0x79   : > { %576 = vmatpush.msrb.mxu1 %v1872_v5  ;;  %720 = vmatpush.msra.mxu2 %v639_v35 }
  0x7a   : > { %743 = vmatpush.msra.mxu3 %v1890_v20 }
  0x7b   : > { %578 = vmatpush.msrb.mxu1 %v1874_v9 }
  0x7c   : > { %580 = vmatmul.f32.vlgmr.msrb.gmra.mxu1 %v1884_v17 }
  0x7d   : > { %689 = vmatpush.msra.mxu1 %v1877_v11  ;;  %745 = vmatmul.f32.vlgmr.msra.gmra.mxu3 %v608_v29 }
  0x7e   : > { %722 = vmatmul.f32.vlgmr.msra.gmra.mxu2 %v608_v29 }
  0x7f   : > { %670 = vmatmul.f32.vlgmr.msra.gmra.mxu0 %v609_v36  ;;  %691 = vmatpush.msra.mxu1 %v1890_v20 }
  0x84   : > { %695 = vmatmul.f32.vlgmr.msra.gmra.mxu1 %v610_v42  ;;  %v974_v42 = vsub.f32 %v972_v40, %v973_v41 }
  0x86   : > { %v975_v43 = vand.u32 4294901760, %v974_v42 }
  0xec   : > { %v425_v50 = vpop.f32.mrf.mxu0 }
  0xf0   : > { %v466_v51 = vpop.f32.mrf.mxu1  ;;  %v523_v54 = vpop.f32.mrf.mxu3 }
  0xf1   : > { %v496_v52 = vpop.f32.mrf.mxu2  ;;  %v467_v53 = vadd.f32 %v466_v51, %v425_v50 }
  0xf3   : > { %v497_v55 = vadd.f32 %v496_v52, %v467_v53 }
  0xf4   : > { %v556_v56 = vpop.f32.mrf.mxu0 }
  0xf5   : > { %v524_v57 = vadd.f32 %v523_v54, %v497_v55 }
  0xf7   : > { %v557_v58 = vadd.f32 %v556_v56, %v524_v57 }
  0xf8   : > { %v645_v62 = vpop.f32.mrf.mxu3 }
  0xf9   : > { %v581_v59 = vpop.f32.mrf.mxu1  ;;  %v614_v60 = vpop.f32.mrf.mxu2 }
  0xfa   : > { %v582_v61 = vadd.f32 %v581_v59, %v557_v58  ;;  %v646_v0 = vadd.f32 %v645_v62, %v614_v60 }
  0xfc   : > { %v584_v63 = vmul.f32 0.25, %v582_v61  ;;  %v671_v1 = vpop.f32.mrf.mxu0 }
  0xfd   : > { %v672_v4 = vadd.f32 %v671_v1, %v646_v0 }
  0xfe   : > { %v750_v2 = vsel %vm395_vm0, %v584_v63, 0 }
  0xff   : > { %v772_v3 = vand.u32 4294901760, %v750_v2 }
 0x100   : > { %v746_v9 = vpop.f32.mrf.mxu3 }
 0x101   : > { %v773_v5 = vsub.f32 %v750_v2, %v772_v3  ;;  %v696_v6 = vpop.f32.mrf.mxu1  ;;  %v723_v7 = vpop.f32.mrf.mxu2 }
 0x102   : > { %v697_v8 = vadd.f32 %v696_v6, %v672_v4 }
 0x103   : > { %v774_v10 = vand.u32 4294901760, %v773_v5 }
 0x104   : > { %v724_v11 = vadd.f32 %v723_v7, %v697_v8 }
 0x105   : > { %v775_v14 = vsub.f32 %v773_v5, %v774_v10 }
 0x106   : > { %v747_v12 = vadd.f32 %v746_v9, %v724_v11 }
 0x107   : > { %v776_v17 = vand.u32 4294901760, %v775_v14 }
 0x108   : > { %v753_v13 = vsel %vm395_vm0, %v747_v12, 0 }
 0x109   : > { %v770_v15 = vand.u32 4294901760, %v753_v13 }
 0x10b   : > { %v797_v16 = vsub.f32 %v753_v13, %v770_v15  ;;  %771 = vmatpush.xpose.msrb.mxu0 %v770_v15  ;;  %847 = vmatpush.xpose.msrb.mxu3 %v770_v15 }
 0x10d   : > { %824 = vmatpush.xpose.msrb.mxu2 %v797_v16  ;;  %v798_v18 = vand.u32 4294901760, %v797_v16 }
 0x10e   : > { %777 = vmatmul.f32.vlgmr.msrb.gmra.mxu0 %v776_v17  ;;  %851 = vmatmul.f32.vlgmr.msrb.gmra.mxu3 %v774_v10 }
 0x10f   : > { %873 = vmatpush.xpose.msra.mxu0 %v798_v18  ;;  %v799_v19 = vsub.f32 %v797_v16, %v798_v18  ;;  %976 = vmatpush.msra.mxu3 %v975_v43 }
 0x110   : > { %827 = vmatmul.f32.vlgmr.msrb.gmra.mxu2 %v773_v5 }
 0x111   : > { %v800_v20 = vand.u32 4294901760, %v799_v19  ;;  %946 = vmatpush.msra.mxu2 %v945_v39  ;;  %1070 = vmatpush.msrb.mxu3 %v945_v39 }
 0x113   : > { %801 = vmatpush.xpose.msrb.mxu1 %v800_v20  ;;  %999 = vmatpush.msrb.mxu0 %v972_v40 }
 0x114   : > { %1048 = vmatpush.msrb.mxu2 %v973_v41 }
 0x116   : > { %803 = vmatmul.f32.vlgmr.msrb.gmra.mxu1 %v772_v3  ;;  %875 = vmatmul.f32.vlgmr.msra.gmra.mxu0 %v772_v3 }
 0x117   : > { %895 = vmatpush.xpose.msra.mxu1 %v770_v15 }
 0x11b   : > { %1022 = vmatpush.msrb.mxu1 %v945_v39 }
 0x11e   : > { %897 = vmatmul.f32.vlgmr.msra.gmra.mxu1 %v772_v3 }
 0x18b   : > { %v778_v21 = vpop.f32.mrf.mxu0 }
 0x191   : > { %v852_v26 = vpop.f32.mrf.mxu3 }
 0x193   : > { %v804_v22 = vpop.f32.mrf.mxu1  ;;  %v828_v24 = vpop.f32.mrf.mxu2 }
 0x194   : > { %v805_v23 = vadd.f32 %v804_v22, %v778_v21  ;;  %v876_v28 = vpop.f32.mrf.mxu0 }
 0x196   : > { %v829_v25 = vadd.f32 %v828_v24, %v805_v23 }
 0x198   : > { %v853_v27 = vadd.f32 %v852_v26, %v829_v25 }
 0x19a   : > { %v877_v29 = vadd.f32 %v876_v28, %v853_v27 }
 0x19b   : > { %v898_v30 = vpop.f32.mrf.mxu1 }
 0x19c   : > { %v899_v31 = vadd.f32 %v898_v30, %v877_v29 }
 0x19e   : > { %v902_v32 = vsel %vm901_vm2, %v899_v31, -inf }
 0x19f   : > { %903 = vmax.xlane.f32.xlu0 %v902_v32 }
 0x212   : > { %v904_v33 = vpop.xlane.xlu0 %903 }
 0x213   : > { %v905_v34 = vsub.f32 %v899_v31, %v904_v33 }
 0x215   : > { %v906_v35 = vmul.f32 1.442695, %v905_v34 }
 0x217   : > { %1387 = vpow2.f32 %v906_v35 }
 0x21d   : > { %v1388_v36 = vpop.eup %1387 }
 0x21e   : > { %v908_v37 = vsel %vm901_vm2, %v1388_v36, 0.0 }
 0x21f   : > { %909 = vadd.xlane.f32.xlu0 %v908_v37 }
 0x292   : > { %v910_v44 = vpop.xlane.xlu0 %909 }
 0x293   : > { %1389 = vrcp.f32 %v910_v44  ;;  %v922_v48 = vand.u32 2147483648, %v910_v44  ;;  %v920_v50 = vand.u32 2147483647, %v910_v44  ;;  %vm916_vm4 = vweird.f32 %v910_v44 }
 0x295   : > { %v923_v52 = vor.u32 1.1754944e-38, %v922_v48  ;;  %vm921_vm6 = vcmp.eq.f32.partialorder %v920_v50, 8.507059e+37 }
 0x299   : > { %v1390_v45 = vpop.eup %1389 }
 0x29a   : > { %v912_v46 = vmul.f32 %v1390_v45, %v910_v44  ;;  %vm917_vm3 = vweird.f32 %v1390_v45 }
 0x29b   : > { %vm918_vm5 = vmor %vm916_vm4, %vm917_vm3 }
 0x29c   : > { %v913_v47 = vsub.f32 1.0, %v912_v46 }
 0x29e   : > { %v914_v49 = vmul.f32 %v1390_v45, %v913_v47 }
 0x2a0   : > { %v915_v51 = vadd.f32 %v1390_v45, %v914_v49 }
 0x2a2   : > { %v919_v53 = vsel %vm918_vm5, %v1390_v45, %v915_v51 }
 0x2a3   : > { %v924_v54 = vsel %vm921_vm6, %v923_v52, %v919_v53 }
 0x2a4   : > { %v925_v55 = vmul.f32 %v1388_v36, %v924_v54 }
 0x2a6   : > { %v928_v56 = vsel %vm901_vm2, %v925_v55, 0  ;;  %1077 = vst.msk [vmem:[%s387_s16] sm:$0xff] %vm901_vm2, %v925_v55 }
 0x2a7   : > { %v947_v57 = vand.u32 4294901760, %v928_v56 }
 0x2a9   : > { %978 = vmatmul.f32.vlgmr.msra.gmra.mxu3 %v947_v57  ;;  %v948_v58 = vsub.f32 %v928_v56, %v947_v57 }
 0x2ab   : > { %1002 = vmatmul.f32.vlgmr.msrb.gmra.mxu0 %v948_v58  ;;  %v949_v59 = vand.u32 4294901760, %v948_v58 }
 0x2ad   : > { %1026 = vmatmul.f32.vlgmr.msrb.gmra.mxu1 %v949_v59  ;;  %v950_v60 = vsub.f32 %v948_v58, %v949_v59 }
 0x2af   : > { %v951_v61 = vand.u32 4294901760, %v950_v60 }
 0x2b1   : > { %952 = vmatmul.f32.vlgmr.msra.gmra.mxu2 %v951_v61  ;;  %1072 = vmatmul.f32.vlgmr.msrb.gmra.mxu3 %v947_v57 }
 0x2b9   : > { %1050 = vmatmul.f32.vlgmr.msrb.gmra.mxu2 %v947_v57 }
 0x2ba   : > { %1568 = shalt.err (!%p1565_p10)
}
 0x2bb   : > { %1318 = dma.vmem_to_hbm [thread:$0]  (%p1757_p0), %s1111_s3, 128, %s1113_s1, %s1084_s10  }
 0x2bc   : > { %s1094_s15 = scalar_lea.hbm %s1980_s5, %s1299_s27  ;;  %s380_s26 = scalar_lea.vmem [#allocation11], %s1849_s25 }
 0x2bd   : > { %s1096_s19 = sshll.u32 %s380_s26, 4  ;;  %s1098_s16 = sshll.u32 %s1094_s15, 4  ;;  %s1097_s19 = int_to_ptr.vmem [resolvable:$true] %s1096_s19  ;;  %s1099_s16 = int_to_ptr.hbm [resolvable:$true] %s1098_s16 }
 0x2be   : > { %s1079_s30 = scalar_lea.sflag [#allocation4], %s1846_s20  ;;  %s1583_s7 = sshra.s32 %s1099_s16, 4  ;;  %s1584_s7 = int_to_ptr.hbm [resolvable:$true] %s1583_s7 }
 0x2bf   : > { %s1585_s9 = scalar_lea.hbm %s1584_s7, 8  ;;  %s1589_s25 = scalar_lea.hbm %s1980_s5, 16 }
 0x2c0   : > { %p1586_p6 = scmp.ne.s32.totalorder %s1584_s7, %s1585_s9  ;;  %p1590_p3 = scmp.lt.s32.totalorder %s1584_s7, %s1980_s5 }
 0x2c1   : > { %p1591_p8 = scmp.lt.s32.totalorder %s1589_s25, %s1585_s9 }
 0x2c2   : > { %p1587_p11 = pnand %p1586_p6, %p1757_p0 }
 0x2c3   : > { %p1592_p13 = por %p1591_p8, %p1590_p3 }
 0x2c4   : > { %p1588_p12 = pneg %p1587_p11 }
 0x2c6   : > { %p1593_p9 = pnand %p1592_p13, %p1588_p12 }
 0x328   : > { %v1003_v1 = vpop.f32.mrf.mxu0 }
 0x32a   : > { %v1027_v3 = vpop.f32.mrf.mxu1 }
 0x32c   : > { %v979_v62 = vpop.f32.mrf.mxu3 }
 0x334   : > { %v953_v63 = vpop.f32.mrf.mxu2  ;;  %v1073_v7 = vpop.f32.mrf.mxu3 }
 0x335   : > { %v980_v0 = vadd.f32 %v979_v62, %v953_v63 }
 0x337   : > { %v1004_v2 = vadd.f32 %v1003_v1, %v980_v0 }
 0x339   : > { %v1028_v4 = vadd.f32 %v1027_v3, %v1004_v2 }
 0x33c   : > { %v1051_v5 = vpop.f32.mrf.mxu2 }
 0x33d   : > { %v1052_v6 = vadd.f32 %v1051_v5, %v1028_v4 }
 0x33f   : > { %v1074_v8 = vadd.f32 %v1073_v7, %v1052_v6 }
 0x341   : > { %1076 = vst.msk [vmem:[%s380_s26] sm:$0xff] %vm586_vm1, %v1074_v8 }
 0x342   : > { %1596 = shalt.err (!%p1593_p9)
}
 0x343   : > { %1317 = dma.vmem_to_hbm [thread:$0]  (%p1757_p0), %s1097_s19, 128, %s1099_s16, %s1079_s30  }
 0x344 PF: > { %s2010_s8 = sld [smem:[#allocation19_spill]]  ;;  %s1124_s18 = sand.u32 1, %s1635_s21  }
 0x345   : > { %s1125_s11 = scalar_lea.sflag [#allocation4], %s1124_s18 }
 0x34a   : > { %p2011_p2 = scmp.ge.s32.totalorder %s2010_s8, 2 }
 0x34c   : > { %p1339_p4 = pnand %p2011_p2, %p1763_p5 }
 0x34e   : > { %p1340_p1 = pneg %p1339_p4 }
 0x350   : > { %1626 = dma.done.wait (%p1340_p1), %s1125_s11, 128  }
 0x351   : > { %1628 = vsyncadd (%p1340_p1), %s1125_s11, 4294967168  ;;  %s1135_s13 = scalar_lea.sflag [#allocation13], %s1124_s18 }
 0x352   : > { %1630 = dma.done.wait (%p1340_p1), %s1135_s13, 128  }
 0x353   : > { %1632 = vsyncadd (%p1340_p1), %s1135_s13, 4294967168  ;;  %s2012_s24 = sld [smem:[#allocation20_spill]]  ;;  %s2014_s21 = smov %s1639_s22 }
 0x354   : > { %s2013_s17 = sld [smem:[#allocation21_spill]]  ;;  %s2015_s22 = smov %s1643_s23 }
 0x359   : > { %p27_p0 = scmp.ge.s32.totalorder %s2012_s24, 4  }
 0x35a   : > { %s2016_s23 = smov %s2013_s17 }
 0x35b   :  { %29 = sbr.rel (!%p27_p0) target bundleno = 13 (0xd), region = 134 }
 0x360   :  { %1141 = vsyncpa [#allocation3], 1 }
 0x361   :  { %1143 = vsyncpa [#allocation3 + $0x1], 1 }
 0x362   :  { %1144 = vsyncpa [#allocation6], 1 }
 0x363   :  { %1146 = vsyncpa [#allocation6 + $0x1], 1 }
 0x364   :  { %1147 = vsyncpa [#allocation9], 1 }
 0x365   :  { %1148 = vsyncpa [#allocation4], 1 }
 0x366   :  { %1150 = vsyncpa [#allocation4 + $0x1], 1 }
 0x367   :  { %1151 = vsyncpa [#allocation13], 1 }
 0x368   :  { %1153 = vsyncpa [#allocation13 + $0x1], 1 }

</bundles_post_ra>
